<compile_context>
chip_gen: v6e
topology: v6e:2x2x1
jax: 0.10.0
libtpu: 0.0.40
codegen_flags: <defaults>
</compile_context>

<pallas_src>
import jax
import jax.numpy as jnp
from jax.experimental import pallas as pl
from jax.experimental.pallas import tpu as pltpu  # noqa: F401  (TPU backend)


def layer_kernel(x_ref, w_ref, p_ref, mask_ref, o_ref):
    # x_ref:    (B, In)   f32
    # w_ref:    (In, Out) f32   (pre-transposed, lane-dense)
    # p_ref:    (8, Out)  f32   row 0 = bias, row 1 = gamma, row 2 = beta
    # mask_ref: (B, Out)  f32   dropout keep-mask (0.0 / 1.0)
    x = x_ref[...]
    w = w_ref[...]
    b = p_ref[0:1, :]       # (1, Out)
    gamma = p_ref[1:2, :]   # (1, Out)
    beta = p_ref[2:3, :]    # (1, Out)

    # Linear (MXU) + bias.
    h = jnp.dot(x, w, preferred_element_type=jnp.float32) + b          # (B, Out)

    # Dropout p=0.5 (training): scale fused into the select -> (h + h) * mask.
    h = (h + h) * mask_ref[...]

    # BatchNorm1d (training): batch stats over axis 0, biased variance, eps=1e-5.
    # Single reduction pass: var = E[h^2] - mean^2.
    inv_b = 1.0 / h.shape[0]
    mean = jnp.sum(h, axis=0, keepdims=True) * inv_b                   # (1, Out)
    var = jnp.sum(h * h, axis=0, keepdims=True) * inv_b - mean * mean  # (1, Out)
    hn = (h - mean) * jax.lax.rsqrt(var + 1e-5)
    y = gamma * hn + beta

    # ReLU.
    o_ref[...] = jnp.maximum(y, 0.0)


def layer_model_forward(x, w, b, gamma, beta, dropout_key):
    """x: (B, In) f32; w: (Out, In) torch layout; b/gamma/beta: (Out,)."""
    B, In = x.shape
    Out = w.shape[0]

    # Lane-dense weight: (In, Out). Pure wrapper-side layout change.
    w_t = jnp.transpose(w)

    # Pack the three (Out,) parameter vectors into one sublane-aligned (8, Out) slab
    # -> one DMA instead of three tiny ones.
    params = (
        jnp.zeros((8, Out), dtype=jnp.float32)
        .at[0].set(b.astype(jnp.float32))
        .at[1].set(gamma.astype(jnp.float32))
        .at[2].set(beta.astype(jnp.float32))
    )

    # Dropout keep-mask computed with jax.random (works on TPU and in interpret
    # mode). TODO(synk): torch's RNG stream for nn.Dropout is not reproduced.
    keep = jax.random.bernoulli(dropout_key, 0.5, (B, Out)).astype(jnp.float32)

    # Grid-less call: single block, every operand fully resident in VMEM.
    return pl.pallas_call(
        layer_kernel,
        out_shape=jax.ShapeDtypeStruct((B, Out), jnp.float32),
    )(x, w_t, params, keep)


if __name__ == "__main__":
    B, inputSize, outputSize = 8, 32, 128

    key = jax.random.PRNGKey(0)
    kx, kw, kdrop = jax.random.split(key, 3)

    # Example input.
    x = jax.random.normal(kx, (B, inputSize), dtype=jnp.float32)

    # Parameters matching the module's __init__:
    #   fc.weight: kaiming_normal_(nonlinearity='relu') -> std = sqrt(2 / fan_in)
    #   fc.bias:   zeros
    #   bn.weight: ones, bn.bias: zeros
    w = jax.random.normal(kw, (outputSize, inputSize), dtype=jnp.float32) * (
        (2.0 / inputSize) ** 0.5
    )
    b = jnp.zeros((outputSize,), dtype=jnp.float32)
    gamma = jnp.ones((outputSize,), dtype=jnp.float32)
    beta = jnp.zeros((outputSize,), dtype=jnp.float32)

    y = layer_model_forward(x, w, b, gamma, beta, kdrop)
    y = jax.block_until_ready(y)

    assert y.shape == (B, outputSize)
    assert bool(jnp.all(jnp.isfinite(y)))
    assert bool(jnp.all(y >= 0.0))  # ReLU output must be non-negative
    # TODO(synk): BatchNorm1d running_mean/running_var buffer updates (module side
    # effects) are not reproduced; forward value matches training-mode batch norm.
    print("KERNEL_OK")
</pallas_src>

<mosaic_0001>
module attributes {stable_mosaic.version = 11 : i64} {
  func.func @layer_kernel(%arg0: memref<8x32xf32, #tpu.memory_space<vmem>>, %arg1: memref<32x128xf32, #tpu.memory_space<vmem>>, %arg2: memref<8x128xf32, #tpu.memory_space<vmem>>, %arg3: memref<8x128xf32, #tpu.memory_space<vmem>>, %arg4: memref<8x128xf32, #tpu.memory_space<vmem>>) attributes {dimension_semantics = [], scalar_prefetch = 0 : i64, scratch_operands = 0 : i64, tpu.core_type = #tpu.core_type<tc>} {
    %c0 = arith.constant 0 : index
    %c0_0 = arith.constant 0 : index
    %0 = vector.load %arg0[%c0, %c0_0] : memref<8x32xf32, #tpu.memory_space<vmem>>, vector<8x32xf32>
    %c0_1 = arith.constant 0 : index
    %c0_2 = arith.constant 0 : index
    %1 = vector.load %arg1[%c0_1, %c0_2] : memref<32x128xf32, #tpu.memory_space<vmem>>, vector<32x128xf32>
    %c0_3 = arith.constant 0 : index
    %c0_4 = arith.constant 0 : index
    %2 = vector.load %arg2[%c0_3, %c0_4] : memref<8x128xf32, #tpu.memory_space<vmem>>, vector<1x128xf32>
    %c1 = arith.constant 1 : index
    %c0_5 = arith.constant 0 : index
    %3 = vector.load %arg2[%c1, %c0_5] : memref<8x128xf32, #tpu.memory_space<vmem>>, vector<1x128xf32>
    %c2 = arith.constant 2 : index
    %c0_6 = arith.constant 0 : index
    %4 = vector.load %arg2[%c2, %c0_6] : memref<8x128xf32, #tpu.memory_space<vmem>>, vector<1x128xf32>
    %cst = arith.constant dense<0.000000e+00> : vector<8x128xf32>
    %5 = tpu.matmul %0, %1, %cst {dimension_numbers = #tpu.dot_dimension_numbers<[1], [0], [0], [1], [0, 0, 1, 1], [], []>} : vector<8x32xf32>, vector<32x128xf32>, vector<8x128xf32> -> vector<8x128xf32>
    %6 = vector.broadcast %2 : vector<1x128xf32> to vector<8x128xf32>
    %7 = arith.addf %5, %6 : vector<8x128xf32>
    %8 = arith.addf %7, %7 : vector<8x128xf32>
    %c0_7 = arith.constant 0 : index
    %c0_8 = arith.constant 0 : index
    %9 = vector.load %arg3[%c0_7, %c0_8] : memref<8x128xf32, #tpu.memory_space<vmem>>, vector<8x128xf32>
    %10 = arith.mulf %8, %9 : vector<8x128xf32>
    %cst_9 = arith.constant dense<0.000000e+00> : vector<128xf32>
    %11 = vector.multi_reduction <add>, %10, %cst_9 [0] : vector<8x128xf32> to vector<128xf32>
    %12 = vector.shape_cast %11 : vector<128xf32> to vector<1x128xf32>
    %cst_10 = arith.constant 1.250000e-01 : f32
    %13 = vector.broadcast %cst_10 : f32 to vector<1x128xf32>
    %14 = arith.mulf %12, %13 : vector<1x128xf32>
    %15 = arith.mulf %10, %10 : vector<8x128xf32>
    %cst_11 = arith.constant dense<0.000000e+00> : vector<128xf32>
    %16 = vector.multi_reduction <add>, %15, %cst_11 [0] : vector<8x128xf32> to vector<128xf32>
    %17 = vector.shape_cast %16 : vector<128xf32> to vector<1x128xf32>
    %cst_12 = arith.constant 1.250000e-01 : f32
    %18 = vector.broadcast %cst_12 : f32 to vector<1x128xf32>
    %19 = arith.mulf %17, %18 : vector<1x128xf32>
    %20 = arith.mulf %14, %14 : vector<1x128xf32>
    %21 = arith.subf %19, %20 : vector<1x128xf32>
    %22 = vector.broadcast %14 : vector<1x128xf32> to vector<8x128xf32>
    %23 = arith.subf %10, %22 : vector<8x128xf32>
    %cst_13 = arith.constant 9.99999974E-6 : f32
    %24 = vector.broadcast %cst_13 : f32 to vector<1x128xf32>
    %25 = arith.addf %21, %24 : vector<1x128xf32>
    %26 = math.rsqrt %25 : vector<1x128xf32>
    %27 = vector.broadcast %26 : vector<1x128xf32> to vector<8x128xf32>
    %28 = arith.mulf %23, %27 : vector<8x128xf32>
    %29 = vector.broadcast %3 : vector<1x128xf32> to vector<8x128xf32>
    %30 = arith.mulf %29, %28 : vector<8x128xf32>
    %31 = vector.broadcast %4 : vector<1x128xf32> to vector<8x128xf32>
    %32 = arith.addf %30, %31 : vector<8x128xf32>
    %cst_14 = arith.constant 0.000000e+00 : f32
    %33 = vector.broadcast %cst_14 : f32 to vector<8x128xf32>
    %34 = arith.maximumf %32, %33 : vector<8x128xf32>
    %c0_15 = arith.constant 0 : index
    %c0_16 = arith.constant 0 : index
    %35 = vector.load %arg4[%c0_15, %c0_16] : memref<8x128xf32, #tpu.memory_space<vmem>>, vector<8x128xf32>
    tpu.vector_store %arg4[%c0_15, %c0_16], %34 {strides = array<i32>} : memref<8x128xf32, #tpu.memory_space<vmem>>, vector<8x128xf32>,
    return
  }
}

</mosaic_0001>

<bundles_post_ra>
// kernel: tpu_custom_call.1
= control target key start
LH: loop header
LB: loop body
LE: loop exit
PB: predicated region body
PF: predicated region fallthrough
CT: control target
= control target key end

     0   :  { %9 = vsyncpa [#allocation3], 0  ;;  %s394_s0 = inlined_call_operand.hbm [shape: f32[8,32], index: 0, kind: input, shape index: {}]   ;;  %s395_s1 = inlined_call_operand.hbm [shape: f32[32,128], index: 1, kind: input, shape index: {}]   ;;  %s396_s2 = inlined_call_operand.hbm [shape: f32[8,128], index: 2, kind: input, shape index: {}]   ;;  %s397_s3 = inlined_call_operand.hbm [shape: f32[8,128], index: 3, kind: input, shape index: {}]   ;;  %s398_s4 = inlined_call_operand.hbm [shape: f32[8,128], index: 4, kind: output, shape index: {}]  }
   0x1   :  { %10 = vsyncpa [#allocation6], 0 }
   0x2   :  { %11 = vsyncpa [#allocation9], 0 }
   0x3   :  { %12 = vsyncpa [#allocation4], 0  ;;  %s345_s15 = smov [#allocation5]  }
   0x4   :  { %s28_s16 = sshll.u32 %s345_s15, 4  ;;  %s29_s16 = int_to_ptr.vmem [resolvable:$true] %s28_s16 }
   0x5   :  { %s245_s17 = scalar_lea.vmem %s29_s16, 512  ;;  %p250_p1 = scmp.lt.s32.totalorder %s29_s16, %s29_s16 }
   0x6   :  { %p246_p0 = scmp.ne.s32.totalorder %s29_s16, %s245_s17  ;;  %p251_p2 = scmp.lt.s32.totalorder %s245_s17, %s245_s17 }
   0x8   :  { %p252_p3 = por %p251_p2, %p250_p1 }
   0xa   :  { %p253_p4 = pnand %p252_p3, %p246_p0 }
   0xc   :  { %256 = shalt.err (!%p253_p4)
}
   0xd   :  { %s346_s18 = smov 128   ;;  %s347_s19 = smov 8  }
   0xe   :  { %34 = dma.hbm_to_vmem [thread:$0]  %s395_s1, 512, %s29_s16, [#allocation6], %s346_s18, %s346_s18, %s347_s19  }
   0xf   :  { %s348_s22 = smov [#allocation2]   ;;  %s349_s24 = smov [#allocation7]  }
  0x10   :  { %s19_s23 = sshll.u32 %s348_s22, 4  ;;  %s41_s25 = sshll.u32 %s349_s24, 4  ;;  %s20_s23 = int_to_ptr.vmem [resolvable:$true] %s19_s23  ;;  %s42_s25 = int_to_ptr.vmem [resolvable:$true] %s41_s25 }
  0x11   :  { %s265_s26 = scalar_lea.vmem %s20_s23, 128  ;;  %p270_p6 = scmp.lt.s32.totalorder %s20_s23, %s20_s23 }
  0x12   :  { %p266_p5 = scmp.ne.s32.totalorder %s20_s23, %s265_s26  ;;  %p271_p7 = scmp.lt.s32.totalorder %s265_s26, %s265_s26 }
  0x14   :  { %p272_p8 = por %p271_p7, %p270_p6 }
  0x16   :  { %p273_p9 = pnand %p272_p8, %p266_p5 }
  0x18   :  { %276 = shalt.err (!%p273_p9)
}
  0x19   :  { %22 = dma.hbm_to_vmem [thread:$0]  %s394_s0, 128, %s20_s23, [#allocation3]  }
  0x1a   :  { %s285_s29 = scalar_lea.vmem %s42_s25, 128  ;;  %p290_p11 = scmp.lt.s32.totalorder %s42_s25, %s42_s25 }
  0x1b   :  { %p286_p10 = scmp.ne.s32.totalorder %s42_s25, %s285_s29  ;;  %p291_p12 = scmp.lt.s32.totalorder %s285_s29, %s285_s29 }
  0x1d   :  { %p292_p13 = por %p291_p12, %p290_p11 }
  0x1f   :  { %p293_p0 = pnand %p292_p13, %p286_p10 }
  0x21   :  { %296 = shalt.err (!%p293_p0)
}
  0x22   :  { %44 = dma.hbm_to_vmem [thread:$0]  %s396_s2, 128, %s42_s25, [#allocation6]  }
  0x23   :  { %s350_s5 = smov [#allocation8]  }
  0x24   :  { %s51_s6 = sshll.u32 %s350_s5, 4  ;;  %s52_s6 = int_to_ptr.vmem [resolvable:$true] %s51_s6 }
  0x25   :  { %s305_s7 = scalar_lea.vmem %s52_s6, 128  ;;  %p310_p2 = scmp.lt.s32.totalorder %s52_s6, %s52_s6 }
  0x26   :  { %p306_p1 = scmp.ne.s32.totalorder %s52_s6, %s305_s7  ;;  %p311_p3 = scmp.lt.s32.totalorder %s305_s7, %s305_s7 }
  0x28   :  { %p312_p4 = por %p311_p3, %p310_p2 }
  0x2a   :  { %p313_p5 = pnand %p312_p4, %p306_p1 }
  0x2c   :  { %316 = shalt.err (!%p313_p5)
}
  0x2d   :  { %54 = dma.hbm_to_vmem [thread:$0]  %s397_s3, 128, %s52_s6, [#allocation9]  }
  0x2e   :  { %337 = dma.done.wait [#allocation3], 128  }
  0x2f   :  { %338 = vsyncadd [#allocation3], 4294967168 }
  0x30   :  { %339 = dma.done.wait [#allocation6], 640  }
  0x31   :  { %340 = vsyncadd [#allocation6], 4294966656 }
  0x32   :  { %341 = dma.done.wait [#allocation9], 128  }
  0x33   :  { %342 = vsyncadd [#allocation9], 4294967168  ;;  %v351_v0 = vmov 0.0   ;;  %vm352_vm0 = vmmov 0   ;;  %v71_v1 = vld [vmem:[#allocation5 + $0x18] sm:$0xff]  ;;  %v70_v2 = vld [vmem:[#allocation5 + $0x10] sm:$0xff] }
  0x34   :  { %215 = vmatprep.subr.mxu0 %v351_v0  ;;  %223 = vmatprep.mubr.msk.f32.mxu0 %vm352_vm0, %v351_v0  ;;  %v69_v3 = vld [vmem:[#allocation5 + $0x8] sm:$0xff]  ;;  %v68_v4 = vld [vmem:[#allocation5] sm:$0xff]  ;;  %v67_v5 = vld [vmem:[#allocation2] sm:$0xff]  ;;  %vm79_vm1 = vcmask 261120   ;;  %s353_s2 = smov [#allocation10]  }
  0x35   :  { %216 = vmatpush3.msra.mxu0 %v71_v1  ;;  %v206_v6 = vld [vmem:[#allocation7] ss:$0 sm:$0xff]  ;;  %v154_v9 = vld [vmem:[#allocation8] sm:$0xff]  ;;  %v208_v33 = vld [vmem:[#allocation7 + $0x1] ss:$0 sm:$0xff]  ;;  %s195_s3 = sshll.u32 %s353_s2, 4  ;;  %s196_s3 = int_to_ptr.vmem [resolvable:$true] %s195_s3 }
  0x36   :  { %217 = vmatprep.subr.mxu0 %v351_v0  ;;  %v209_v35 = vld [vmem:[#allocation7 + $0x2] ss:$0 sm:$0xff]  ;;  %s317_s9 = scalar_lea.vmem %s196_s3, 128  ;;  %p322_p7 = scmp.lt.s32.totalorder %s196_s3, %s196_s3 }
  0x37   :  { %218 = vmatpush3.msra.mxu0 %v70_v2  ;;  %p318_p6 = scmp.ne.s32.totalorder %s196_s3, %s317_s9  ;;  %p323_p8 = scmp.lt.s32.totalorder %s317_s9, %s317_s9 }
  0x38   :  { %219 = vmatprep.subr.mxu0 %v351_v0 }
  0x39   :  { %220 = vmatpush3.msra.mxu0 %v69_v3  ;;  %p324_p9 = por %p323_p8, %p322_p7 }
  0x3a   :  { %221 = vmatprep.subr.mxu0 %v351_v0 }
  0x3b   :  { %222 = vmatpush3.msra.mxu0 %v68_v4  ;;  %p325_p10 = pnand %p324_p9, %p318_p6 }
  0x3c   :  { %224 = vmatmul.mubr.msk.f32.vlgmr.msra.gmra.mxu0 %vm79_vm1, %v67_v5 }
  0xfc   :  { %v149_v7 = vpop.f32.mrf.mxu0 }
  0xfd   :  { %v150_v8 = vadd.f32 %v206_v6, %v149_v7 }
  0xfe   :  { %v225_v10 = vpop.f32.mrf.mxu0 }
  0xff   :  { %v153_v11 = vadd.f32 %v150_v8, %v150_v8 }
 0x101   :  { %v155_v12 = vmul.f32 %v154_v9, %v153_v11 }
 0x103   :  { %v156_v13 = vrot.slane %v155_v12, 4  ;;  %v163_v14 = vmul.f32 %v155_v12, %v155_v12 }
 0x105   :  { %v157_v15 = vadd.f32 %v156_v13, %v155_v12  ;;  %v164_v16 = vrot.slane %v163_v14, 4 }
 0x107   :  { %v158_v17 = vrot.slane %v157_v15, 2  ;;  %v165_v18 = vadd.f32 %v164_v16, %v163_v14 }
 0x109   :  { %v159_v19 = vadd.f32 %v158_v17, %v157_v15  ;;  %v166_v20 = vrot.slane %v165_v18, 2 }
 0x10b   :  { %v167_v21 = vadd.f32 %v166_v20, %v165_v18  ;;  %v160_v22 = vrot.slane %v159_v19, 1 }
 0x10d   :  { %v168_v23 = vrot.slane %v167_v21, 1  ;;  %v161_v24 = vadd.f32 %v160_v22, %v159_v19 }
 0x10f   :  { %v169_v25 = vadd.f32 %v168_v23, %v167_v21  ;;  %v162_v26 = vmul.f32 0.125, %v161_v24 }
 0x111   :  { %v170_v27 = vmul.f32 0.125, %v169_v25  ;;  %v171_v28 = vmul.f32 %v162_v26, %v162_v26  ;;  %v173_v31 = vsub.f32 %v155_v12, %v162_v26 }
 0x113   :  { %v172_v29 = vsub.f32 %v170_v27, %v171_v28 }
 0x115   :  { %v174_v30 = vadd.f32 1e-05, %v172_v29 }
 0x117   :  { %235 = vrsqrt.f32 %v174_v30 }
 0x124   :  { %v236_v32 = vpop.eup %235 }
 0x125   :  { %v176_v34 = vmul.f32 %v236_v32, %v173_v31 }
 0x127   :  { %v181_v36 = vmul.f32 %v208_v33, %v176_v34 }
 0x129   :  { %v186_v37 = vadd.f32 %v209_v35, %v181_v36 }
 0x12b   :  { %v187_v38 = vmax.f32 %v186_v37, 0.0 }
 0x12d   :  { %188 = vst [vmem:[#allocation10] sm:$0xff] %v187_v38 }
 0x12e   :  { %328 = shalt.err (!%p325_p10)
}
 0x12f   :  { %198 = dma.vmem_to_hbm [thread:$0]  %s196_s3, 128, %s398_s4, [#allocation4]  }
 0x130   :  { %343 = dma.done.wait [#allocation4], 128  }
 0x131   :  { %344 = vsyncadd [#allocation4], 4294967168 }
 0x132   :  { %202 = vsyncpa [#allocation3], 1 }
 0x133   :  { %203 = vsyncpa [#allocation6], 1 }
 0x134   :  { %204 = vsyncpa [#allocation9], 1 }
 0x135   :  { %205 = vsyncpa [#allocation4], 1 }

</bundles_post_ra>
